<compile_context>
chip_gen: v7x
topology: tpu7x:2x2x1
jax: 0.10.0
libtpu: 0.0.40
codegen_flags: <defaults>
</compile_context>

<pallas_src>
import functools
from itertools import combinations

import numpy as np
import jax
import jax.numpy as jnp
from jax import lax
from jax.experimental import pallas as pl
from jax.experimental.pallas import tpu as pltpu


def _q_star_matrix(q_np: np.ndarray) -> np.ndarray:
    """Interaction-only polynomial features of the Q-matrix columns (degrees
    2..K), matching sklearn.PolynomialFeatures(interaction_only=True)[:, K:]."""
    K = q_np.shape[1]
    cols = []
    for deg in range(2, K + 1):
        for comb in combinations(range(K), deg):
            cols.append(np.prod(q_np[:, comb], axis=1))
    return np.stack(cols, axis=1).astype(np.float32)  # (J, 2^K - 1 - K)


def qpnn_kernel(x_ref, w1t_ref, b1t_ref, w2t_ref, b2t_ref, y_ref, *, K, KL, GK):
    """One batch tile of the fused QPNN forward, batch on the lane axis.

    x_ref  : (J, TB)        bf16, one batch tile of xᵀ
    w1t_ref: (GK + K, J)    f32  = [wl1 | 2*ws1*q_star | wm*q]ᵀ
    b1t_ref: (GK + K, 1)    f32  = [bl1 | 2*bs1        | bm  ]ᵀ
    w2t_ref: (2K, GK)       f32  = blockdiag(wl2, 2*ws2*(q_starᵀ@q))ᵀ
    b2t_ref: (2K, 1)        f32  = [bl2 | 2*bs2]ᵀ
    y_ref  : (K, TB)        f32, one batch tile of yᵀ
    KL = K* + K (rows of the l1 block), GK = KL + K* (rows of [l1 | s1]).
    """
    x = x_ref[...].astype(jnp.float32)                               # (J, TB)

    # --- fused stage 1: one MXU dot -> rows [l1_pre | 2*s1_pre | m_pre] ---
    h1 = jnp.dot(w1t_ref[...], x,
                 preferred_element_type=jnp.float32) + b1t_ref[...]  # (GK+K, TB)
    m = jax.nn.relu(h1[GK:, :])                                      # (K, TB)

    # Single sigmoid pass over the [l1 | s1] rows; tanh rows are recovered
    # with tanh(z) = 2*sigmoid(2z) - 1 (the x2 is pre-folded into W1ᵀ/b1).
    t = jax.nn.sigmoid(h1[:GK, :])                                   # (GK, TB)
    row = lax.broadcasted_iota(jnp.int32, t.shape, 0)
    g = jnp.where(row < KL, t, 2.0 * t - 1.0)                        # (GK, TB)

    # --- fused stage 2: block-diagonal dot -> rows [l2_pre | 2*s2_pre] ---
    h2 = jnp.dot(w2t_ref[...], g,
                 preferred_element_type=jnp.float32) + b2t_ref[...]  # (2K, TB)
    t2 = jax.nn.sigmoid(h2)                                          # one EUP pass
    l = t2[:K, :]                                                    # (K, TB)
    s = 2.0 * t2[K:, :] - 1.0                                        # tanh rows

    # y = sigmoid(l * m + (1 - l) * s)
    y_ref[...] = jax.nn.sigmoid(l * m + (1.0 - l) * s)


def qpnn_forward(x, q, q_star, params, *, block_b=32768):
    """QPNN forward.  x: (B, J) float; returns (B, K) float32."""
    B, J = x.shape
    K = q.shape[1]
    Kstar = q_star.shape[1]
    KL = Kstar + K                      # rows of wl1 / bl1
    GK = KL + Kstar                     # rows of the [l1 | s1] block

    f32 = jnp.float32
    q = q.astype(f32)
    q_star = q_star.astype(f32)

    # ------------- parameter-only precomputation (hoisted, transposed) -------
    wm_q = params["wm"].astype(f32) * q                    # (J, K)
    ws1_qs = params["ws1"].astype(f32) * q_star            # (J, K*)
    ws2_m = params["ws2"].astype(f32) * (q_star.T @ q)     # (K*, K)

    # Stage-1 fused weight/bias, transposed (rows = output features).  The s1
    # (tanh) block is pre-scaled by 2 for the tanh-via-sigmoid trick.
    w1t = jnp.concatenate([params["wl1"].astype(f32).T,
                           2.0 * ws1_qs.T,
                           wm_q.T], axis=0)                           # (GK+K, J)
    b1t = jnp.concatenate([params["bl1"].astype(f32).T,
                           2.0 * params["bs1"].astype(f32).T,
                           params["bm"].astype(f32).T], axis=0)       # (GK+K, 1)

    # Stage-2 fused weight/bias: transposed block-diagonal, tanh block x2.
    w2t = jnp.zeros((2 * K, GK), dtype=f32)
    w2t = w2t.at[:K, :KL].set(params["wl2"].astype(f32).T)
    w2t = w2t.at[K:, KL:].set(2.0 * ws2_m.T)                          # (2K, GK)
    b2t = jnp.concatenate([params["bl2"].astype(f32).T,
                           2.0 * params["bs2"].astype(f32).T], axis=0)  # (2K, 1)

    # ------------- batch-on-lanes tiling -------------
    lanes = 128
    bp_units = pl.cdiv(B, lanes)                   # 128-lane groups needed
    max_units = max(1, block_b // lanes)
    nb = pl.cdiv(bp_units, max_units)              # grid steps
    if nb < 2 and bp_units >= 2:
        nb = 2                                     # keep both v7x TCs busy
    tb_units = pl.cdiv(bp_units, nb)
    TB = tb_units * lanes                          # lane-aligned batch tile
    Bp = nb * TB

    # x transposed to (J, B): batch on lanes, bf16 stream (exact for 0/1 data).
    x_t = x.astype(jnp.bfloat16).T                                    # (J, B)
    if Bp != B:
        x_t = jnp.pad(x_t, ((0, 0), (0, Bp - B)))

    kernel = functools.partial(qpnn_kernel, K=K, KL=KL, GK=GK)
    y_t = pl.pallas_call(
        kernel,
        out_shape=jax.ShapeDtypeStruct((K, Bp), f32),
        grid=(nb,),
        in_specs=[
            pl.BlockSpec((J, TB), lambda i: (0, i)),       # x: streamed per tile
            pl.BlockSpec(w1t.shape, lambda i: (0, 0)),     # weights: resident
            pl.BlockSpec(b1t.shape, lambda i: (0, 0)),
            pl.BlockSpec(w2t.shape, lambda i: (0, 0)),
            pl.BlockSpec(b2t.shape, lambda i: (0, 0)),
        ],
        out_specs=pl.BlockSpec((K, TB), lambda i: (0, i)),  # lane-dense output
        compiler_params=pltpu.CompilerParams(
            dimension_semantics=("parallel",)),             # 2-TC sharding (v7x)
    )(x_t, w1t, b1t, w2t, b2t)

    return y_t[:, :B].T                                               # (B, K)


def qpnn_reference(x, q, q_star, p):
    """Plain-JAX mirror of the PyTorch QPNN.forward (f32)."""
    m = jax.nn.relu(x @ (p["wm"] * q) + p["bm"])
    l = jax.nn.sigmoid(x @ p["wl1"] + p["bl1"])
    l = jax.nn.sigmoid(l @ p["wl2"] + p["bl2"])
    s = jnp.tanh(x @ (p["ws1"] * q_star) + p["bs1"])
    s = jnp.tanh(s @ (p["ws2"] * (q_star.T @ q)) + p["bs2"])
    return jax.nn.sigmoid(l * m + (1 - l) * s)


if __name__ == "__main__":
    # Small problem: J=16 items, K=4 skills -> K* = 2^4 - 1 - 4 = 11.
    J, K = 16, 4

    # Deterministic binary Q matrix (every row non-zero).
    q_np = np.zeros((J, K), dtype=np.float32)
    for j in range(J):
        code = (j % (2 ** K - 1)) + 1
        for k in range(K):
            q_np[j, k] = (code >> k) & 1
    q_star_np = _q_star_matrix(q_np)
    Kstar = q_star_np.shape[1]

    q = jnp.asarray(q_np)
    q_star = jnp.asarray(q_star_np)

    key = jax.random.PRNGKey(0)
    keys = jax.random.split(key, 12)
    params = {
        "wm":  jax.random.normal(keys[0], (J, K), jnp.float32),
        "bm":  jax.random.normal(keys[1], (1, K), jnp.float32),
        "wl1": jax.random.normal(keys[2], (J, Kstar + K), jnp.float32),
        "bl1": jax.random.normal(keys[3], (1, Kstar + K), jnp.float32),
        "wl2": jax.random.normal(keys[4], (Kstar + K, K), jnp.float32),
        "bl2": jax.random.normal(keys[5], (1, K), jnp.float32),
        "ws1": jax.random.normal(keys[6], (J, Kstar), jnp.float32),
        "bs1": jax.random.normal(keys[7], (1, Kstar), jnp.float32),
        "ws2": jax.random.normal(keys[8], (Kstar, K), jnp.float32),
        "bs2": jax.random.normal(keys[9], (1, K), jnp.float32),
    }

    # --- test 1: multi-tile path with a ragged batch (B not a multiple of
    #             8/128) so padding + the 2-step grid are both exercised ---
    B1 = 515
    x1 = (jax.random.uniform(keys[10], (B1, J)) > 0.5).astype(jnp.float32)
    y1 = jax.block_until_ready(qpnn_forward(x1, q, q_star, params))
    y1_ref = qpnn_reference(x1, q, q_star, params)
    np.testing.assert_allclose(np.asarray(y1), np.asarray(y1_ref),
                               rtol=1e-5, atol=2e-5)

    # --- test 2: tiny single-tile path (B < 128) ---
    B2 = 8
    x2 = (jax.random.uniform(keys[11], (B2, J)) > 0.5).astype(jnp.float32)
    y2 = jax.block_until_ready(qpnn_forward(x2, q, q_star, params))
    y2_ref = qpnn_reference(x2, q, q_star, params)
    np.testing.assert_allclose(np.asarray(y2), np.asarray(y2_ref),
                               rtol=1e-5, atol=2e-5)

    print("KERNEL_OK")
</pallas_src>

<mosaic_0001>
module attributes {stable_mosaic.version = 11 : i64} {
  func.func @qpnn_kernel(%arg0: i32, %arg1: memref<16x384xbf16, #tpu.memory_space<vmem>>, %arg2: memref<30x16xf32, #tpu.memory_space<vmem>>, %arg3: memref<30x1xf32, #tpu.memory_space<vmem>>, %arg4: memref<8x26xf32, #tpu.memory_space<vmem>>, %arg5: memref<8x1xf32, #tpu.memory_space<vmem>>, %arg6: memref<4x384xf32, #tpu.memory_space<vmem>>) attributes {dimension_semantics = [#tpu.dimension_semantics<parallel>], iteration_bounds = array<i64: 2>, scalar_prefetch = 0 : i64, scratch_operands = 0 : i64, tpu.core_type = #tpu.core_type<tc>, window_params = [{transform_indices = @transform_0, window_bounds = array<i64: 16, 384>}, {pipeline_mode = #tpu.pipeline_mode<synchronous>, transform_indices = @transform_1, window_bounds = array<i64: 30, 16>}, {pipeline_mode = #tpu.pipeline_mode<synchronous>, transform_indices = @transform_2, window_bounds = array<i64: 30, 1>}, {pipeline_mode = #tpu.pipeline_mode<synchronous>, transform_indices = @transform_3, window_bounds = array<i64: 8, 26>}, {pipeline_mode = #tpu.pipeline_mode<synchronous>, transform_indices = @transform_4, window_bounds = array<i64: 8, 1>}, {transform_indices = @transform_5, window_bounds = array<i64: 4, 384>}]} {
    %c0 = arith.constant 0 : index
    %c0_0 = arith.constant 0 : index
    %0 = vector.load %arg1[%c0, %c0_0] : memref<16x384xbf16, #tpu.memory_space<vmem>>, vector<16x384xbf16>
    %1 = arith.extf %0 : vector<16x384xbf16> to vector<16x384xf32>
    %c0_1 = arith.constant 0 : index
    %c0_2 = arith.constant 0 : index
    %2 = vector.load %arg2[%c0_1, %c0_2] : memref<30x16xf32, #tpu.memory_space<vmem>>, vector<30x16xf32>
    %cst = arith.constant dense<0.000000e+00> : vector<30x384xf32>
    %3 = tpu.matmul %2, %1, %cst {dimension_numbers = #tpu.dot_dimension_numbers<[1], [0], [0], [1], [0, 0, 1, 1], [], []>} : vector<30x16xf32>, vector<16x384xf32>, vector<30x384xf32> -> vector<30x384xf32>
    %c0_3 = arith.constant 0 : index
    %c0_4 = arith.constant 0 : index
    %4 = vector.load %arg3[%c0_3, %c0_4] : memref<30x1xf32, #tpu.memory_space<vmem>>, vector<30x1xf32>
    %5 = vector.broadcast %4 : vector<30x1xf32> to vector<30x384xf32>
    %6 = arith.addf %3, %5 : vector<30x384xf32>
    %7 = vector.extract_strided_slice %6 {offsets = [26, 0], sizes = [4, 384], strides = [1, 1]} : vector<30x384xf32> to vector<4x384xf32>
    %cst_5 = arith.constant 0.000000e+00 : f32
    %8 = vector.broadcast %cst_5 : f32 to vector<4x384xf32>
    %9 = arith.maximumf %7, %8 : vector<4x384xf32>
    %10 = vector.extract_strided_slice %6 {offsets = [0, 0], sizes = [26, 384], strides = [1, 1]} : vector<30x384xf32> to vector<26x384xf32>
    %11 = arith.negf %10 : vector<26x384xf32>
    %12 = math.exp %11 : vector<26x384xf32>
    %cst_6 = arith.constant 1.000000e+00 : f32
    %13 = vector.broadcast %cst_6 : f32 to vector<26x384xf32>
    %14 = arith.addf %13, %12 : vector<26x384xf32>
    %15 = arith.divf %13, %14 : vector<26x384xf32>
    %16 = tpu.iota {dimensions = array<i32: 0>} : vector<26x384xi32>
    %c15_i32 = arith.constant 15 : i32
    %17 = vector.broadcast %c15_i32 : i32 to vector<26x384xi32>
    %18 = arith.cmpi slt, %16, %17 : vector<26x384xi32>
    %cst_7 = arith.constant 2.000000e+00 : f32
    %19 = vector.broadcast %cst_7 : f32 to vector<26x384xf32>
    %20 = arith.mulf %19, %15 : vector<26x384xf32>
    %cst_8 = arith.constant 1.000000e+00 : f32
    %21 = vector.broadcast %cst_8 : f32 to vector<26x384xf32>
    %22 = arith.subf %20, %21 : vector<26x384xf32>
    %23 = arith.select %18, %15, %22 : vector<26x384xi1>, vector<26x384xf32>
    %c0_9 = arith.constant 0 : index
    %c0_10 = arith.constant 0 : index
    %24 = vector.load %arg4[%c0_9, %c0_10] : memref<8x26xf32, #tpu.memory_space<vmem>>, vector<8x26xf32>
    %cst_11 = arith.constant dense<0.000000e+00> : vector<8x384xf32>
    %25 = tpu.matmul %24, %23, %cst_11 {dimension_numbers = #tpu.dot_dimension_numbers<[1], [0], [0], [1], [0, 0, 1, 1], [], []>} : vector<8x26xf32>, vector<26x384xf32>, vector<8x384xf32> -> vector<8x384xf32>
    %c0_12 = arith.constant 0 : index
    %c0_13 = arith.constant 0 : index
    %26 = vector.load %arg5[%c0_12, %c0_13] : memref<8x1xf32, #tpu.memory_space<vmem>>, vector<8x1xf32>
    %27 = vector.broadcast %26 : vector<8x1xf32> to vector<8x384xf32>
    %28 = arith.addf %25, %27 : vector<8x384xf32>
    %29 = arith.negf %28 : vector<8x384xf32>
    %30 = math.exp %29 : vector<8x384xf32>
    %cst_14 = arith.constant 1.000000e+00 : f32
    %31 = vector.broadcast %cst_14 : f32 to vector<8x384xf32>
    %32 = arith.addf %31, %30 : vector<8x384xf32>
    %33 = arith.divf %31, %32 : vector<8x384xf32>
    %34 = vector.extract_strided_slice %33 {offsets = [0, 0], sizes = [4, 384], strides = [1, 1]} : vector<8x384xf32> to vector<4x384xf32>
    %35 = vector.extract_strided_slice %33 {offsets = [4, 0], sizes = [4, 384], strides = [1, 1]} : vector<8x384xf32> to vector<4x384xf32>
    %cst_15 = arith.constant 2.000000e+00 : f32
    %36 = vector.broadcast %cst_15 : f32 to vector<4x384xf32>
    %37 = arith.mulf %36, %35 : vector<4x384xf32>
    %cst_16 = arith.constant 1.000000e+00 : f32
    %38 = vector.broadcast %cst_16 : f32 to vector<4x384xf32>
    %39 = arith.subf %37, %38 : vector<4x384xf32>
    %40 = arith.mulf %34, %9 : vector<4x384xf32>
    %cst_17 = arith.constant 1.000000e+00 : f32
    %41 = vector.broadcast %cst_17 : f32 to vector<4x384xf32>
    %42 = arith.subf %41, %34 : vector<4x384xf32>
    %43 = arith.mulf %42, %39 : vector<4x384xf32>
    %44 = arith.addf %40, %43 : vector<4x384xf32>
    %45 = arith.negf %44 : vector<4x384xf32>
    %46 = math.exp %45 : vector<4x384xf32>
    %cst_18 = arith.constant 1.000000e+00 : f32
    %47 = vector.broadcast %cst_18 : f32 to vector<4x384xf32>
    %48 = arith.addf %47, %46 : vector<4x384xf32>
    %49 = arith.divf %47, %48 : vector<4x384xf32>
    %c0_19 = arith.constant 0 : index
    %c0_20 = arith.constant 0 : index
    %50 = vector.load %arg6[%c0_19, %c0_20] : memref<4x384xf32, #tpu.memory_space<vmem>>, vector<4x384xf32>
    tpu.vector_store %arg6[%c0_19, %c0_20], %49 {strides = array<i32>} : memref<4x384xf32, #tpu.memory_space<vmem>>, vector<4x384xf32>,
    return
  }
  func.func @transform_0(%arg0: i32) -> (i32, i32) {
    %c0_i32 = arith.constant 0 : i32
    %c0_i32_0 = arith.constant 0 : i32
    return %c0_i32, %arg0 : i32, i32
  }
  func.func @transform_1(%arg0: i32) -> (i32, i32) {
    %c0_i32 = arith.constant 0 : i32
    %c0_i32_0 = arith.constant 0 : i32
    %c0_i32_1 = arith.constant 0 : i32
    return %c0_i32, %c0_i32_0 : i32, i32
  }
  func.func @transform_2(%arg0: i32) -> (i32, i32) {
    %c0_i32 = arith.constant 0 : i32
    %c0_i32_0 = arith.constant 0 : i32
    %c0_i32_1 = arith.constant 0 : i32
    return %c0_i32, %c0_i32_0 : i32, i32
  }
  func.func @transform_3(%arg0: i32) -> (i32, i32) {
    %c0_i32 = arith.constant 0 : i32
    %c0_i32_0 = arith.constant 0 : i32
    %c0_i32_1 = arith.constant 0 : i32
    return %c0_i32, %c0_i32_0 : i32, i32
  }
  func.func @transform_4(%arg0: i32) -> (i32, i32) {
    %c0_i32 = arith.constant 0 : i32
    %c0_i32_0 = arith.constant 0 : i32
    %c0_i32_1 = arith.constant 0 : i32
    return %c0_i32, %c0_i32_0 : i32, i32
  }
  func.func @transform_5(%arg0: i32) -> (i32, i32) {
    %c0_i32 = arith.constant 0 : i32
    %c0_i32_0 = arith.constant 0 : i32
    return %c0_i32, %arg0 : i32, i32
  }
}

</mosaic_0001>

<bundles_post_ra>
// kernel: tpu_custom_call.1
= control target key start
LH: loop header
LB: loop body
LE: loop exit
PB: predicated region body
PF: predicated region fallthrough
CT: control target
= control target key end

     0   :  { %10 = vsyncpa [#allocation4], 0  ;;  %s1443_s0 = inlined_call_operand.vmem [shape: bf16[16,768], index: 0, kind: input, shape index: {}]   ;;  %s1444_s1 = inlined_call_operand.vmem [shape: f32[30,16], index: 1, kind: input, shape index: {}]   ;;  %s1445_s2 = inlined_call_operand.vmem [shape: f32[30,1], index: 2, kind: input, shape index: {}]   ;;  %s1446_s3 = inlined_call_operand.vmem [shape: f32[8,26], index: 3, kind: input, shape index: {}]   ;;  %s1447_s4 = inlined_call_operand.vmem [shape: f32[8,1], index: 4, kind: input, shape index: {}]   ;;  %s1448_s5 = inlined_call_operand.hbm [shape: f32[4,768], index: 5, kind: output, shape index: {}]  }
   0x1   :  { %12 = vsyncpa [#allocation4 + $0x1], 0  ;;  %s1277_s18 = smov 0   ;;  %s1279_s19 = smov 0  }
   0x2   :  { %s1281_s20 = smov 0   ;;  %s1283_s21 = smov 0  }
   0x3 LB: > { %s928_s22 = sadd.s32 4294967295, %s1239_s21   ;;  %s929_s23 = sadd.s32 4294967294, %s1239_s21   ;;  %s1239_s21 = sphi %s1283_s21, %s1454_s21   ;;  %s1235_s20 = sphi %s1281_s20, %s1453_s20   ;;  %s1231_s19 = sphi %s1279_s19, %s1452_s19   ;;  %s1227_s18 = sphi %s1277_s18, %s1451_s18  }
   0x4   : > { %s1300_s24 = sadd.s32 1, %s1239_s21   ;;  %s25_s25 = sadd.s32 1, %s1235_s20 }
   0x5   : > { %s22_s26 = ssub.s32 %s1239_s21, %s1300_s24  ;;  %p32_p0 = scmp.ne.s32.totalorder %s1235_s20, %s1231_s19 }
   0x6   : > { %p23_p1 = scmp.eq.s32.totalorder %s22_s26, 0  ;;  %p33_p2 = scmp.eq.s32.totalorder %s1239_s21, 0 }
   0x7   : > { %p146_p3 = scmp.eq.s32.totalorder %s928_s22, 1  ;;  %p151_p4 = scmp.ne.s32.totalorder %s1231_s19, %s1227_s18 }
   0x8   : > { %s1313_s27 = scalar_select %p23_p1, %s1235_s20, %s25_s25  }
   0x9   : > { %p34_p5 = por %p33_p2, %p32_p0  ;;  %p1315_p6 = por %p146_p3, %p32_p0 }
   0xa   : > { %p152_p7 = scmp.eq.s32.totalorder %s929_s23, 1  ;;  %p931_p9 = scmp.ge.s32.totalorder %s1239_s21, 2 }
   0xc   : > { %p1319_p8 = por %p152_p7, %p151_p4  ;;  %180 = sbr.rel (%p931_p9) target bundleno = 26 (0x1a), region = 32 }
  0x13   : > { %183 = sbr.rel (!%p34_p5) target bundleno = 26 (0x1a), region = 36  ;;  %s185_s30 = sand.u32 (%p34_p5), 1, %s1235_s20  }
  0x14   : > { %s987_s6 = smul.u32 (%p34_p5), 12, %s1239_s21 }
  0x15   : > { %s1052_s7 = smul.u32 (%p34_p5), 24, %s185_s30 }
  0x16   : > { %s190_s10 = scalar_lea.vmem (%p34_p5), %s1443_s0, %s987_s6 }
  0x17   : > { %v205_v0 = vld [vmem:[%s190_s10] sm:$0xff] (%p34_p5)  ;;  %v207_v1 = vld [vmem:[%s190_s10 + $0x18] sm:$0xff] (%p34_p5)  ;;  %v933_v2 = vld [vmem:[%s190_s10 + $0x8] sm:$0xf] (%p34_p5)  ;;  %s187_s11 = scalar_lea.vmem (%p34_p5), [#allocation2], %s1052_s7 }
  0x18   : > { %206 = vst [vmem:[%s187_s11] sm:$0xff] (%p34_p5), %v205_v0  ;;  %208 = vst [vmem:[%s187_s11 + $0xc] sm:$0xff] (%p34_p5), %v207_v1  ;;  %v935_v3 = vld [vmem:[%s190_s10 + $0x20] sm:$0xf] (%p34_p5) }
  0x19   : > { %934 = vst [vmem:[%s187_s11 + $0x8] sm:$0xf] (%p34_p5), %v933_v2  ;;  %936 = vst [vmem:[%s187_s11 + $0x14] sm:$0xf] (%p34_p5), %v935_v3 }
  0x1a PF: > { %p937_p10 = scmp.ge.s32.totalorder %s1239_s21, 1  ;;  %p224_p11 = scmp.lt.s32.totalorder %s1239_s21, 3 }
  0x1c   : > { %p225_p12 = pnand %p937_p10, %p224_p11 }
  0x1d   : > { %s1334_s12 = sand.u32 (!%p225_p12), 1, %s1231_s19   ;;  %v1241_v4 = vmov (!%p225_p12), 0.0   ;;  %v275_v5 = vld [vmem:[%s1445_s2 + $0x8] sm:$0xff] (!%p225_p12)  ;;  %v1242_v6 = vmov (!%p225_p12), 0   ;;  %v276_v7 = vld [vmem:[%s1445_s2 + $0x10] sm:$0xff] (!%p225_p12)  ;;  %v274_v8 = vld [vmem:[%s1445_s2] sm:$0xff] (!%p225_p12) }
  0x1e   : > { %228 = sbr.rel (%p225_p12) target bundleno = 593 (0x251), region = 62  ;;  %375 = vmatprep.mubr.f32.mxu0 (!%p225_p12), %v1241_v4  ;;  %393 = vmatprep.mubr.f32.mxu1 (!%p225_p12), %v1241_v4  ;;  %v277_v12 = vld [vmem:[%s1445_s2 + $0x18] sm:$0x3f] (!%p225_p12)  ;;  %v270_v13 = vld [vmem:[%s1444_s1] sm:$0xff] (!%p225_p12)  ;;  %vm298_vm0 = vcmask (!%p225_p12), 130048   ;;  %v271_v16 = vld [vmem:[%s1444_s1 + $0x8] sm:$0xff] (!%p225_p12) }
  0x1f   : > { %s1053_s13 = smul.u32 (!%p225_p12), 24, %s1334_s12  ;;  %1099 = vset.pattern.permute.xlu0 (!%p225_p12), %v1242_v6  ;;  %1100 = vset.pattern.permute.xlu1 (!%p225_p12), %v1242_v6  ;;  %v273_v14 = vld [vmem:[%s1444_s1 + $0x18] sm:$0x3f] (!%p225_p12)  ;;  %v606_v15 = vld [vmem:[%s1447_s4] sm:$0xff] (!%p225_p12)  ;;  %v272_v17 = vld [vmem:[%s1444_s1 + $0x10] sm:$0xff] (!%p225_p12)  ;;  %v1243_v18 = vmov (!%p225_p12), 0.0|0.0  }
  0x20   : > { %285 = vperm.xlu0 (!%p225_p12), %1099, %v275_v5   ;;  %290 = vperm.xlu1 (!%p225_p12), %1100, %v276_v7   ;;  %vm1244_vm1 = vmmov (!%p225_p12), 0   ;;  %vm616_vm3 = vcmask (!%p225_p12), 1041408   ;;  %vm1245_vm4 = vmmov (!%p225_p12), 1   ;;  %vm612_vm6 = vcmask (!%p225_p12), 211968   ;;  %s988_s30 = smul.u32 (!%p225_p12), 192, %s928_s22  ;;  %s846_s11 = scalar_lea.sflag (!%p225_p12), [#allocation4], %s1334_s12 }
  0x21   : > { %s233_s26 = scalar_lea.vmem (!%p225_p12), [#allocation2], %s1053_s13  ;;  %vm1034_vm5 = vmpackc.low (!%p225_p12), %vm616_vm3, %vm1245_vm4  ;;  %s1246_s13 = smov (!%p225_p12), [#allocation3]  }
  0x22   : > { %v1101_v9 = vld [vmem:[%s233_s26 + $0x4] ss:$12 sps:$4 sm:$0xff] (!%p225_p12)   ;;  %v1103_v10 = vld [vmem:[%s233_s26] ss:$12 sps:$4 sm:$0xff] (!%p225_p12)   ;;  %v1104_v11 = vld [vmem:[%s233_s26 + $0x8] ss:$12 sps:$4 sm:$0xff] (!%p225_p12)   ;;  %s1399_s10 = scalar_lea.hbm (!%p225_p12), %s1448_s5, %s988_s30 }
  0x23   : > { %1022 = vmatprep.subr.bf16.mxu0 (!%p225_p12), %v1101_v9  ;;  %1046 = vmatprep.subr.bf16.mxu1 (!%p225_p12), %v1101_v9  ;;  %s1054_s26 = smul.u32 (!%p225_p12), 12, %s1334_s12  ;;  %s1181_s14 = sshll.u32 (!%p225_p12), %s1246_s13, 4  ;;  %s1182_s14 = int_to_ptr.vmem [resolvable:$false] %s1181_s14 }
  0x24   : > { %1024 = vmatpush1.bf16.msra.mxu0 (!%p225_p12), %v1103_v10  ;;  %1047 = vmatpush1.bf16.msra.mxu1 (!%p225_p12), %v1103_v10  ;;  %v560_v10 = vlaneseq (!%p225_p12)  ;;  %s1183_s15 = scalar_lea.vmem (!%p225_p12), %s1182_s14, 384 }
  0x25   : > { %1026 = vmatprep.subr.bf16.mxu1 %v1104_v11  ;;  %280 = vperm.xlu0 %1099, %v274_v8   ;;  %s257_s6 = scalar_lea.vmem [#allocation3], %s1054_s26 }
  0x26   : > { %295 = vperm.xlu1 %1100, %v277_v12   ;;  %1039 = vmatprep.subr.bf16.mxu0 %v1243_v18  ;;  %s860_s7 = sshll.u32 %s257_s6, 4  ;;  %s1401_s7 = int_to_ptr.vmem [resolvable:$true] %s860_s7 }
  0x27   : > { %938 = vmatmul.mubr.msk.f32.vlgmr.msra.gmra.mrb[0].mxu0 %vm298_vm0, %v270_v13  ;;  %941 = vmatmul.mubr.msk.f32.vlgmr.msra.gmra.mrb[0].mxu1 %vm298_vm0, %v273_v14  ;;  %s1177_s22 = scalar_lea.vmem %s1401_s7, 192  ;;  %p1184_p2 = scmp.lt.s32.totalorder %s1401_s7, %s1182_s14 }
  0x28   : > { %1028 = vmatpush3.bf16.msra.mxu1 %v1104_v11  ;;  %381 = vmatprep.mubr.f32.mxu0 %v1241_v4  ;;  %p1178_p13 = scmp.ne.s32.totalorder %s1401_s7, %s1177_s22  ;;  %p1185_p3 = scmp.lt.s32.totalorder %s1183_s15, %s1177_s22 }
  0x29   : > { %1004 = vmatprep.mubr.msk.f32.mxu1 %vm298_vm0, %v270_v13  ;;  %609 = vperm.xlu0 %1099, %v606_v15  }
  0x2a   : > { %p1179_p0 = pnand %p1178_p13, %p1315_p6  ;;  %p1186_p4 = por %p1185_p3, %p1184_p2 }
  0x2b   : > { %939 = vmatmul.mubr.msk.f32.gmra.mrb[2].mxu0 %vm298_vm0, %v271_v16  ;;  %1005 = vmatmul.mubr.msk.f32.vlgmr.msra.gmra.mrb[2].mxu1 %vm298_vm0, %v271_v16 }
  0x2c   : > { %387 = vmatprep.mubr.f32.mxu0 %v1241_v4  ;;  %1007 = vmatprep.mubr.msk.f32.mxu1 %vm298_vm0, %v272_v17  ;;  %p1180_p1 = pneg %p1179_p0 }
  0x2e   : > { %p1187_p5 = pnand %p1186_p4, %p1180_p1 }
  0x2f   : > { %940 = vmatmul.mubr.msk.f32.gmra.mrb[4].mxu0 %vm298_vm0, %v272_v17  ;;  %1008 = vmatmul.mubr.msk.f32.gmra.mrb[4].mxu1 %vm298_vm0, %v273_v14 }
  0x30   : > { %690 = vmatprep.mubr.f32.mxu1 %v1241_v4  ;;  %1018 = vmatprep.mubr.msk.f32.mxu0 %vm1244_vm1, %v1241_v4 }
  0x9f   : > { %v286_v19 = vpop.permute.xlu0 %285  ;;  %v291_v20 = vpop.permute.xlu1 %290 }
  0xa4   : > { %v281_v21 = vpop.permute.xlu0 %280 }
  0xa5   : > { %v296_v22 = vpop.permute.xlu1 %295 }
  0xfa   : > { %v377_v23 = vpop.f32.mrb[0].mxu0  ;;  %v395_v24 = vpop.f32.mrb[0].mxu1 }
  0xfb   : > { %v378_v25 = vadd.f32 %v377_v23, %v281_v21  ;;  %v1373_v26 = vadd.f32 %v395_v24, %v296_v22  ;;  %v379_v27 = vpop.f32.mrb[1].mxu0  ;;  %v397_v28 = vpop.f32.mrb[1].mxu1 }
  0xfc   : > { %v380_v29 = vadd.f32 %v379_v27, %v281_v21  ;;  %v1375_v30 = vadd.f32 %v397_v28, %v296_v22 }
  0xfd   : > { %v946_v31 = vmul.f32 -1.442695, %v378_v25  ;;  %v955_v32 = vmul.f32 -1.442695, %v1373_v26 }
  0xfe   : > { %v947_v33 = vmul.f32 -1.442695, %v380_v29  ;;  %v956_v34 = vmul.f32 -1.442695, %v1375_v30  ;;  %v383_v35 = vpop.f32.mrb[2].mxu0  ;;  %v1006_v37 = vpop.f32.mrb[2].mxu1 }
  0xff   : > { %1105 = vpow2.f32 %v946_v31  ;;  %v384_v36 = vadd.f32 %v383_v35, %v286_v19  ;;  %v385_v38 = vpop.f32.mrb[3].mxu0  ;;  %v472_v39 = vadd.f32 %v1006_v37, %v286_v19  ;;  %v466_v41 = vpop.f32.mrb[3].mxu1 }
 0x100   : > { %1107 = vpow2.f32 %v955_v32  ;;  %v386_v40 = vadd.f32 %v385_v38, %v286_v19  ;;  %v467_v43 = vadd.f32 %v466_v41, %v281_v21 }
 0x101   : > { %1109 = vpow2.f32 %v947_v33  ;;  %v949_v42 = vmul.f32 -1.442695, %v384_v36  ;;  %v951_v44 = vmul.f32 -1.442695, %v472_v39 }
 0x102   : > { %1111 = vpow2.f32 %v956_v34  ;;  %v950_v45 = vmul.f32 -1.442695, %v386_v40  ;;  %v389_v46 = vpop.f32.mrb[4].mxu0  ;;  %v1009_v47 = vpop.f32.mrb[4].mxu1  ;;  %v948_v48 = vmul.f32 -1.442695, %v467_v43 }
 0x103   : > { %1113 = vpow2.f32 %v949_v42  ;;  %v390_v49 = vadd.f32 %v389_v46, %v291_v20  ;;  %v1379_v50 = vadd.f32 %v1009_v47, %v296_v22  ;;  %v391_v51 = vpop.f32.mrb[5].mxu0  ;;  %v476_v52 = vpop.f32.mrb[5].mxu1 }
 0x104   : > { %1115 = vpow2.f32 %v951_v44  ;;  %v392_v53 = vadd.f32 %v391_v51, %v291_v20  ;;  %v477_v54 = vadd.f32 %v476_v52, %v291_v20  ;;  %v561_v20 = vshrl.u32 %v560_v10, 7 }
 0x105   : > { %1117 = vpow2.f32 %v950_v45  ;;  %v952_v55 = vmul.f32 -1.442695, %v390_v49  ;;  %v957_v56 = vmul.f32 -1.442695, %v1379_v50 }
 0x106   : > { %1119 = vpow2.f32 %v948_v48  ;;  %v953_v57 = vmul.f32 -1.442695, %v392_v53  ;;  %v954_v58 = vmul.f32 -1.442695, %v477_v54  ;;  %v562_v25 = vadd.s32 8, %v561_v20 }
 0x107   : > { %1121 = vpow2.f32 %v952_v55  ;;  %v485_v20 = vmax.f32 %v1373_v26, 0.0 }
 0x108   : > { %1123 = vpow2.f32 %v957_v56  ;;  %vm566_vm2 = vcmp.lt.s32.totalorder %v562_v25, 15 }
 0x109   : > { %v1106_v59 = vpop.eup %1105  ;;  %1125 = vpow2.f32 %v953_v57 }
 0x10a   : > { %v1108_v60 = vpop.eup %1107  ;;  %v524_v61 = vadd.f32 1.0, %v1106_v59  ;;  %1127 = vpow2.f32 %v954_v58 }
 0x10b   : > { %v1110_v62 = vpop.eup %1109  ;;  %v533_v63 = vadd.f32 1.0, %v1108_v60 }
 0x10c   : > { %v1112_v0 = vpop.eup %1111  ;;  %1129 = vrcp.f32 %v524_v61  ;;  %v525_v1 = vadd.f32 1.0, %v1110_v62 }
 0x10d   : > { %v1114_v2 = vpop.eup %1113  ;;  %1131 = vrcp.f32 %v533_v63  ;;  %v534_v3 = vadd.f32 1.0, %v1112_v0 }
 0x10e   : > { %v1116_v4 = vpop.eup %1115  ;;  %1133 = vrcp.f32 %v525_v1  ;;  %v527_v5 = vadd.f32 1.0, %v1114_v2  ;;  %v605_v1 = vld [vmem:[%s1446_s3] sm:$0xff]  ;;  %v610_v2 = vpop.permute.xlu0 %609 }
 0x10f   : > { %v1118_v6 = vpop.eup %1117  ;;  %1135 = vrcp.f32 %v534_v3  ;;  %v529_v7 = vadd.f32 1.0, %v1116_v4 }
 0x110   : > { %v1120_v8 = vpop.eup %1119  ;;  %1137 = vrcp.f32 %v527_v5  ;;  %v528_v9 = vadd.f32 1.0, %v1118_v6 }
 0x111   : > { %v1122_v11 = vpop.eup %1121  ;;  %1139 = vrcp.f32 %v529_v7  ;;  %v526_v12 = vadd.f32 1.0, %v1120_v8 }
 0x112   : > { %v1124_v13 = vpop.eup %1123  ;;  %1141 = vrcp.f32 %v528_v9  ;;  %v530_v14 = vadd.f32 1.0, %v1122_v11 }
 0x113   : > { %v1126_v15 = vpop.eup %1125  ;;  %1143 = vrcp.f32 %v526_v12  ;;  %v535_v16 = vadd.f32 1.0, %v1124_v13 }
 0x114   : > { %v1128_v17 = vpop.eup %1127  ;;  %1145 = vrcp.f32 %v530_v14  ;;  %v531_v19 = vadd.f32 1.0, %v1126_v15 }
 0x115   : > { %1147 = vrcp.f32 %v535_v16  ;;  %v532_v21 = vadd.f32 1.0, %v1128_v17 }
 0x116   : > { %v1130_v22 = vpop.eup %1129  ;;  %1149 = vrcp.f32 %v531_v19  ;;  %v487_v19 = vmax.f32 %v1379_v50, 0.0 }
 0x117   : > { %v1132_v23 = vpop.eup %1131  ;;  %1151 = vrcp.f32 %v532_v21  ;;  %v486_v21 = vmax.f32 %v1375_v30, 0.0 }
 0x118   : > { %v1134_v24 = vpop.eup %1133  ;;  %v578_v33 = vmul.f32 2.0, %v1132_v23 }
 0x119   : > { %v1136_v27 = vpop.eup %1135 }
 0x11a   : > { %v1138_v28 = vpop.eup %1137  ;;  %v579_v41 = vmul.f32 2.0, %v1136_v27  ;;  %v967_v46 = vadd.f32 -1.0, %v578_v33  ;;  %v795_v27 = vrot.slane %v486_v21, 2 }
 0x11b   : > { %v1140_v29 = vpop.eup %1139  ;;  %v572_v31 = vmul.f32 2.0, %v1138_v28 }
 0x11c   : > { %v1142_v32 = vpop.eup %1141  ;;  %v574_v34 = vmul.f32 2.0, %v1140_v29  ;;  %v968_v61 = vadd.f32 -1.0, %v579_v41 }
 0x11d   : > { %v1144_v35 = vpop.eup %1143  ;;  %v573_v36 = vmul.f32 2.0, %v1142_v32  ;;  %v961_v37 = vadd.f32 -1.0, %v572_v31 }
 0x11e   : > { %v1146_v38 = vpop.eup %1145  ;;  %v963_v39 = vadd.f32 -1.0, %v574_v34 }
 0x11f   : > { %v1148_v40 = vpop.eup %1147  ;;  %v575_v42 = vmul.f32 2.0, %v1146_v38  ;;  %v962_v43 = vadd.f32 -1.0, %v573_v36  ;;  %v596_v44 = vsel %vm566_vm2, %v1138_v28, %v961_v37 }
 0x120   : > { %v1150_v45 = vpop.eup %1149  ;;  %v580_v47 = vmul.f32 2.0, %v1148_v40  ;;  %v598_v48 = vsel %vm566_vm2, %v1140_v29, %v963_v39  ;;  %v1031_v49 = vpack.c.bf16 %v596_v44, %v1130_v22  ;;  %v796_v22 = vrot.slane %v487_v19, 2 }
 0x121   : > { %v1152_v51 = vpop.eup %1151  ;;  %v964_v52 = vadd.f32 -1.0, %v575_v42  ;;  %v576_v53 = vmul.f32 2.0, %v1150_v45  ;;  %v1040_v54 = vpack.c.bf16 %v598_v48, %v1144_v35  ;;  %v597_v55 = vsel %vm566_vm2, %v1142_v32, %v962_v43 }
 0x122   : > { %v969_v56 = vadd.f32 -1.0, %v580_v47  ;;  %v577_v57 = vmul.f32 2.0, %v1152_v51  ;;  %v1029_v58 = vpack.c.bf16 %v597_v55, %v1134_v24  ;;  %v794_v24 = vrot.slane %v485_v20, 2 }
 0x123   : > { %v1036_v59 = vpack.c.bf16 %v967_v46, %v964_v52  ;;  %v965_v60 = vadd.f32 -1.0, %v576_v53  ;;  %1041 = vmatpush3.bf16.msra.mxu0 %v1040_v54 }
 0x124   : > { %v966_v62 = vadd.f32 -1.0, %v577_v57  ;;  %1030 = vmatprep.subr.bf16.mxu1 %v1029_v58  ;;  %1042 = vmatprep.subr.bf16.mxu0 %v1243_v18 }
 0x125   : > { %1032 = vmatpush1.bf16.msra.mxu1 %v1031_v49  ;;  %v1033_v63 = vpack.c.bf16 %v968_v61, %v965_v60 }
 0x126   : > { %v1043_v0 = vpack.c.bf16 %v969_v56, %v966_v62 }
 0x127   : > { %1035 = vmatprep.subr.msk.bf16.mxu1 %vm1034_vm5, %v1033_v63 }
 0x128   : > { %1045 = vmatpush3.bf16.msk.msra.mxu0 %vm1034_vm5, %v1043_v0 }
 0x129   : > { %1038 = vmatpush1.bf16.msk.msra.mxu1 %vm1034_vm5, %v1036_v59 }
 0x12b   : > { %1019 = vmatmul.mubr.msk.f32.vlgmr.msra.gmra.mrb[6].mxu0 %vm612_vm6, %v605_v1 }
 0x12c   : > { %972 = vmatmul.mubr.msk.f32.vlgmr.msra.gmra.mrb[6].mxu1 %vm612_vm6, %v605_v1 }
 0x1fe   : > { %v763_v3 = vpop.f32.mrb[6].mxu0 }
 0x1ff   : > { %v764_v4 = vadd.f32 %v763_v3, %v610_v2  ;;  %v692_v18 = vpop.f32.mrb[6].mxu1  ;;  %v1020_v5 = vpop.f32.mrb[7].mxu0 }
 0x200   : > { %v693_v6 = vadd.f32 %v692_v18, %v610_v2  ;;  %v694_v7 = vpop.f32.mrb[7].mxu1 }
 0x201   : > { %v977_v8 = vmul.f32 -1.442695, %v764_v4  ;;  %v695_v9 = vadd.f32 %v694_v7, %v610_v2 }
 0x202   : > { %v975_v10 = vmul.f32 -1.442695, %v693_v6 }
 0x203   : > { %1153 = vpow2.f32 %v977_v8  ;;  %v976_v11 = vmul.f32 -1.442695, %v695_v9 }
 0x204   : > { %1155 = vpow2.f32 %v975_v10 }
 0x205   : > { %1157 = vpow2.f32 %v976_v11 }
 0x20d   : > { %v1154_v12 = vpop.eup %1153 }
 0x20e   : > { %v1156_v13 = vpop.eup %1155  ;;  %v778_v14 = vadd.f32 1.0, %v1154_v12 }
 0x20f   : > { %v1158_v15 = vpop.eup %1157  ;;  %v776_v16 = vadd.f32 1.0, %v1156_v13 }
 0x210   : > { %1159 = vrcp.f32 %v778_v14  ;;  %v777_v17 = vadd.f32 1.0, %v1158_v15 }
 0x211   : > { %1161 = vrcp.f32 %v776_v16 }
 0x212   : > { %1163 = vrcp.f32 %v777_v17 }
 0x21a   : > { %v1160_v23 = vpop.eup %1159 }
 0x21b   : > { %v1162_v25 = vpop.eup %1161  ;;  %v787_v28 = vmul.f32 2.0, %v1160_v23  ;;  %v802_v29 = vmul.f32 %v1160_v23, %v796_v22  ;;  %v805_v50 = vsub.f32 1.0, %v1160_v23 }
 0x21c   : > { %v1164_v31 = vpop.eup %1163  ;;  %v785_v32 = vmul.f32 2.0, %v1162_v25  ;;  %v800_v33 = vmul.f32 %v1162_v25, %v794_v24  ;;  %v803_v26 = vsub.f32 1.0, %v1162_v25 }
 0x21d   : > { %v786_v34 = vmul.f32 2.0, %v1164_v31  ;;  %v980_v35 = vadd.f32 -1.0, %v787_v28  ;;  %v801_v36 = vmul.f32 %v1164_v31, %v795_v27  ;;  %v804_v30 = vsub.f32 1.0, %v1164_v31 }
 0x21e   : > { %v978_v37 = vadd.f32 -1.0, %v785_v32 }
 0x21f   : > { %v979_v38 = vadd.f32 -1.0, %v786_v34  ;;  %v811_v39 = vrot.slane %v980_v35, 4 }
 0x220   : > { %v809_v40 = vrot.slane %v978_v37, 4 }
 0x221   : > { %v810_v41 = vrot.slane %v979_v38, 4  ;;  %v817_v42 = vmul.f32 %v811_v39, %v805_v50 }
 0x222   : > { %v815_v43 = vmul.f32 %v809_v40, %v803_v26 }
 0x223   : > { %v816_v44 = vmul.f32 %v810_v41, %v804_v30  ;;  %v820_v45 = vadd.f32 %v817_v42, %v802_v29 }
 0x224   : > { %v818_v46 = vadd.f32 %v815_v43, %v800_v33 }
 0x225   : > { %v819_v47 = vadd.f32 %v816_v44, %v801_v36  ;;  %v983_v48 = vmul.f32 -1.442695, %v820_v45 }
 0x226   : > { %v981_v49 = vmul.f32 -1.442695, %v818_v46 }
 0x227   : > { %v982_v51 = vmul.f32 -1.442695, %v819_v47  ;;  %1165 = vpow2.f32 %v983_v48 }
 0x228   : > { %1167 = vpow2.f32 %v981_v49 }
 0x229   : > { %1169 = vpow2.f32 %v982_v51 }
 0x231   : > { %v1166_v52 = vpop.eup %1165 }
 0x232   : > { %v1168_v53 = vpop.eup %1167  ;;  %v832_v54 = vadd.f32 1.0, %v1166_v52 }
 0x233   : > { %v1170_v55 = vpop.eup %1169  ;;  %v830_v56 = vadd.f32 1.0, %v1168_v53 }
 0x234   : > { %v831_v57 = vadd.f32 1.0, %v1170_v55  ;;  %1171 = vrcp.f32 %v832_v54 }
 0x235   : > { %1173 = vrcp.f32 %v830_v56 }
 0x236   : > { %1175 = vrcp.f32 %v831_v57 }
 0x23e   : > { %v1172_v58 = vpop.eup %1171 }
 0x23f   : > { %v1174_v59 = vpop.eup %1173  ;;  %844 = vst [vmem:[%s257_s6 + $0x8] sm:$0xf] %v1172_v58 }
 0x240   : > { %v1176_v60 = vpop.eup %1175 }
 0x241   : > { %v841_v61 = vcombine.low %v1174_v59, %v1176_v60 }
 0x243   : > { %843 = vst [vmem:[%s257_s6] sm:$0xff] %v841_v61 }
 0x244   : > { %1190 = shalt.err (!%p1187_p5)
}
 0x245   : > { %s1191_s12 = scalar_lea.hbm %s1399_s10, 192  ;;  %s1195_s23 = scalar_lea.hbm %s1448_s5, 384 }
 0x246   : > { %p1192_p7 = scmp.ne.s32.totalorder %s1399_s10, %s1191_s12  ;;  %p1196_p12 = scmp.lt.u32.totalorder %s1399_s10, %s1448_s5 }
 0x247   : > { %p1197_p13 = scmp.lt.u32.totalorder %s1195_s23, %s1191_s12  ;;  %p1199_p1 = scmp.lt.u32.totalorder %s1191_s12, %s1399_s10 }
 0x248   : > { %p1193_p10 = pnand %p1192_p7, %p1315_p6 }
 0x249   : > { %p1198_p0 = por %p1197_p13, %p1196_p12 }
 0x24a   : > { %p1194_p11 = pneg %p1193_p10 }
 0x24b   : > { %p1200_p2 = por %p1199_p1, %p1198_p0 }
 0x24d   : > { %p1201_p3 = pnand %p1200_p2, %p1194_p11 }
 0x24f   : > { %1204 = shalt.err (!%p1201_p3)
}
 0x250   : > { %1055 = dma.vmem_to_hbm [thread:$0]  (%p1315_p6), %s1401_s7, 192, %s1399_s10, %s846_s11  }
 0x251 PF: > { %s872_s30 = sand.u32 1, %s1227_s18   ;;  %p1058_p4 = pnand %p931_p9, %p1319_p8 }
 0x252   : > { %s873_s6 = scalar_lea.sflag [#allocation4], %s872_s30 }
 0x253   : > { %1222 = dma.done.wait (!%p1058_p4), %s873_s6, 192  }
 0x254   : > { %1224 = vsyncadd (!%p1058_p4), %s873_s6, 4294967104  ;;  %p15_p5 = scmp.ge.s32.totalorder %s1300_s24, 4   ;;  %s1451_s18 = smov %s1231_s19 }
 0x255   : > { %s1452_s19 = smov %s1235_s20  ;;  %s1453_s20 = smov %s1313_s27 }
 0x256   : > { %s1454_s21 = smov %s1300_s24  ;;  %17 = sbr.rel (!%p15_p5) target bundleno = 3 (0x3), region = 112 }
 0x25d   :  { %878 = vsyncpa [#allocation4], 1 }
 0x25e   :  { %880 = vsyncpa [#allocation4 + $0x1], 1 }

</bundles_post_ra>
